<compile_context>
chip_gen: v7x
topology: tpu7x:2x2x1
jax: 0.10.0
libtpu: 0.0.40
codegen_flags: <defaults>
</compile_context>

<pallas_src>
import jax
import jax.numpy as jnp
from jax.experimental import pallas as pl
from jax.experimental.pallas import tpu as pltpu


def actor_kernel(max_action_ref, state_ref,
                 w1_ref, b1_ref, w2_ref, b2_ref, w3_ref, b3_ref, out_ref):
    """One batch tile of the Actor forward pass, entirely in VMEM."""
    # Layer 1: Linear(state_dim -> 400) + ReLU.
    a = jnp.dot(state_ref[...].astype(w1_ref.dtype), w1_ref[...],
                preferred_element_type=jnp.float32) + b1_ref[...]
    a = jnp.maximum(a, 0.0)
    # Layer 2: Linear(400 -> 300) + ReLU.
    a = jnp.dot(a.astype(w2_ref.dtype), w2_ref[...],
                preferred_element_type=jnp.float32) + b2_ref[...]
    a = jnp.maximum(a, 0.0)
    # Layer 3: Linear(300 -> action_dim), tanh, scale by max_action (SMEM).
    a = jnp.dot(a.astype(w3_ref.dtype), w3_ref[...],
                preferred_element_type=jnp.float32) + b3_ref[...]
    out_ref[...] = max_action_ref[0] * jnp.tanh(a)


def _round_up(x, m):
    return (x + m - 1) // m * m


def _mxu_m_align():
    """Native MXU M-block: 128 on v2-v5 generations, 256 on v6e / v7x."""
    try:
        kind = jax.devices()[0].device_kind.lower()
    except Exception:
        return 256
    if any(f"v{g}" in kind for g in (2, 3, 4, 5)):
        return 128
    return 256


def _choose_batch_tile(B, block_batch, align):
    """Pick the batch tile size (sublane-aligned, MXU-aligned when large)."""
    b8 = _round_up(B, 8)
    if b8 <= align:
        # Rollout-sized batches: one ragged, sublane-aligned tile.
        return b8
    cap = max(align, _round_up(block_batch, align))
    tb = min(cap, _round_up(b8, align))
    # Prefer an even number of tiles (>= 2) so both v7x TensorCores get
    # balanced work; shrink in MXU-aligned steps until the count is even.
    while tb > align and pl.cdiv(B, tb) % 2 == 1:
        tb -= align
    return tb


def actor_forward(state, params, max_action, *, block_batch=512):
    """Runs the Actor forward pass for a (B, state_dim) batch of states."""
    w1, b1, w2, b2, w3, b3 = params
    B, state_dim = state.shape
    action_dim = w3.shape[1]

    align = _mxu_m_align()
    tb = _choose_batch_tile(B, block_batch, align)
    nb = pl.cdiv(B, tb)  # ragged last tile handled by Pallas; no host-side pad

    # Runtime scalar in SMEM (no recompile when max_action changes).
    max_action_arr = jnp.asarray([max_action], dtype=jnp.float32)

    # Weights/biases: whole-array blocks with a constant block index, so they
    # are DMA'd once and stay resident in VMEM across all batch tiles.
    def resident(arr):
        return pl.BlockSpec(arr.shape, lambda i: (0,) * arr.ndim)

    out = pl.pallas_call(
        actor_kernel,
        out_shape=jax.ShapeDtypeStruct((B, action_dim), jnp.float32),
        grid=(nb,),
        in_specs=[
            pl.BlockSpec(memory_space=pltpu.MemorySpace.SMEM),  # max_action
            pl.BlockSpec((tb, state_dim), lambda i: (i, 0)),    # state tile
            resident(w1), resident(b1),
            resident(w2), resident(b2),
            resident(w3), resident(b3),
        ],
        out_specs=pl.BlockSpec((tb, action_dim), lambda i: (i, 0)),
        compiler_params=pltpu.CompilerParams(
            dimension_semantics=("parallel",),
        ),
    )(max_action_arr, state, w1, b1, w2, b2, w3, b3)

    return out


def init_actor_params(key, state_dim, action_dim, *, weight_dtype=jnp.bfloat16):
    """Deterministic synthetic init (uniform, roughly PyTorch-Linear-like).

    Weights are stored as (in_features, out_features) in `weight_dtype`
    (bf16 by default, halving HBM traffic); biases stay float32.
    """
    k1, k2, k3, k4, k5, k6 = jax.random.split(key, 6)

    def lin(kw, kb, fan_in, fan_out):
        bound = 1.0 / (fan_in ** 0.5)
        w = jax.random.uniform(kw, (fan_in, fan_out), jnp.float32, -bound, bound)
        b = jax.random.uniform(kb, (1, fan_out), jnp.float32, -bound, bound)
        return w.astype(weight_dtype), b

    w1, b1 = lin(k1, k2, state_dim, 400)
    w2, b2 = lin(k3, k4, 400, 300)
    w3, b3 = lin(k5, k6, 300, action_dim)
    return (w1, b1, w2, b2, w3, b3)


def actor_reference(state, params, max_action):
    """Plain-JAX reference using the same mixed-precision recipe."""
    w1, b1, w2, b2, w3, b3 = params

    def dot(x, w):
        return jnp.dot(x.astype(w.dtype), w, preferred_element_type=jnp.float32)

    a = jnp.maximum(dot(state, w1) + b1, 0.0)
    a = jnp.maximum(dot(a, w2) + b2, 0.0)
    return max_action * jnp.tanh(dot(a, w3) + b3)


if __name__ == "__main__":
    state_dim = 16
    action_dim = 4
    max_action = 2.0

    key = jax.random.PRNGKey(0)
    pkey, skey = jax.random.split(key)
    params = init_actor_params(pkey, state_dim, action_dim)

    # Small batch (original DDPG use-case: batch=2) -> single ragged tile.
    state_small = jax.random.normal(skey, (2, state_dim), jnp.float32)
    out_small = jax.block_until_ready(actor_forward(state_small, params, max_action))
    assert out_small.shape == (2, action_dim)

    # Medium batch: single sublane-aligned ragged tile (70 -> tile of 72).
    state_med = jax.random.normal(jax.random.PRNGKey(1), (70, state_dim), jnp.float32)
    out_med = jax.block_until_ready(actor_forward(state_med, params, max_action))
    assert out_med.shape == (70, action_dim)

    # Large batch: MXU-aligned tiles, even tile count, ragged last tile,
    # weights VMEM-resident across all tiles, no host-side pad.
    state_big = jax.random.normal(jax.random.PRNGKey(2), (1300, state_dim), jnp.float32)
    out_big = jax.block_until_ready(actor_forward(state_big, params, max_action))
    assert out_big.shape == (1300, action_dim)

    # Check against the mixed-precision plain-JAX reference (same math).
    ref_small = actor_reference(state_small, params, max_action)
    ref_med = actor_reference(state_med, params, max_action)
    ref_big = actor_reference(state_big, params, max_action)
    assert jnp.allclose(out_small, ref_small, atol=1e-3, rtol=1e-3)
    assert jnp.allclose(out_med, ref_med, atol=1e-3, rtol=1e-3)
    assert jnp.allclose(out_big, ref_big, atol=1e-3, rtol=1e-3)

    # Sanity-check against a full-float32 reference (PyTorch-module semantics);
    # only bf16 weight quantization separates the two.
    w1, b1, w2, b2, w3, b3 = params
    f32_params = (w1.astype(jnp.float32), b1, w2.astype(jnp.float32), b2,
                  w3.astype(jnp.float32), b3)
    ref_f32 = actor_reference(state_small, f32_params, max_action)
    assert jnp.allclose(out_small, ref_f32, atol=2e-2, rtol=2e-2)

    print("KERNEL_OK")
</pallas_src>

<mosaic_0001>
module attributes {stable_mosaic.version = 11 : i64} {
  func.func @actor_kernel(%arg0: i32, %arg1: memref<1xf32, #tpu.memory_space<smem>>, %arg2: memref<8x16xf32, #tpu.memory_space<vmem>>, %arg3: memref<16x400xbf16, #tpu.memory_space<vmem>>, %arg4: memref<1x400xf32, #tpu.memory_space<vmem>>, %arg5: memref<400x300xbf16, #tpu.memory_space<vmem>>, %arg6: memref<1x300xf32, #tpu.memory_space<vmem>>, %arg7: memref<300x4xbf16, #tpu.memory_space<vmem>>, %arg8: memref<1x4xf32, #tpu.memory_space<vmem>>, %arg9: memref<8x4xf32, #tpu.memory_space<vmem>>) attributes {dimension_semantics = [#tpu.dimension_semantics<parallel>], iteration_bounds = array<i64: 1>, scalar_prefetch = 0 : i64, scratch_operands = 0 : i64, tpu.core_type = #tpu.core_type<tc>, window_params = [{transform_indices = @transform_0, window_bounds = array<i64: 1>}, {transform_indices = @transform_1, window_bounds = array<i64: 8, 16>}, {pipeline_mode = #tpu.pipeline_mode<synchronous>, transform_indices = @transform_2, window_bounds = array<i64: 16, 400>}, {pipeline_mode = #tpu.pipeline_mode<synchronous>, transform_indices = @transform_3, window_bounds = array<i64: 1, 400>}, {pipeline_mode = #tpu.pipeline_mode<synchronous>, transform_indices = @transform_4, window_bounds = array<i64: 400, 300>}, {pipeline_mode = #tpu.pipeline_mode<synchronous>, transform_indices = @transform_5, window_bounds = array<i64: 1, 300>}, {pipeline_mode = #tpu.pipeline_mode<synchronous>, transform_indices = @transform_6, window_bounds = array<i64: 300, 4>}, {pipeline_mode = #tpu.pipeline_mode<synchronous>, transform_indices = @transform_7, window_bounds = array<i64: 1, 4>}, {transform_indices = @transform_8, window_bounds = array<i64: 8, 4>}]} {
    %c0 = arith.constant 0 : index
    %c0_0 = arith.constant 0 : index
    %0 = vector.load %arg2[%c0, %c0_0] : memref<8x16xf32, #tpu.memory_space<vmem>>, vector<8x16xf32>
    %1 = arith.truncf %0 : vector<8x16xf32> to vector<8x16xbf16>
    %c0_1 = arith.constant 0 : index
    %c0_2 = arith.constant 0 : index
    %2 = vector.load %arg3[%c0_1, %c0_2] : memref<16x400xbf16, #tpu.memory_space<vmem>>, vector<16x400xbf16>
    %cst = arith.constant dense<0.000000e+00> : vector<8x400xf32>
    %3 = tpu.matmul %1, %2, %cst {dimension_numbers = #tpu.dot_dimension_numbers<[1], [0], [0], [1], [0, 0, 1, 1], [], []>} : vector<8x16xbf16>, vector<16x400xbf16>, vector<8x400xf32> -> vector<8x400xf32>
    %c0_3 = arith.constant 0 : index
    %c0_4 = arith.constant 0 : index
    %4 = vector.load %arg4[%c0_3, %c0_4] : memref<1x400xf32, #tpu.memory_space<vmem>>, vector<1x400xf32>
    %5 = vector.broadcast %4 : vector<1x400xf32> to vector<8x400xf32>
    %6 = arith.addf %3, %5 : vector<8x400xf32>
    %cst_5 = arith.constant 0.000000e+00 : f32
    %7 = vector.broadcast %cst_5 : f32 to vector<8x400xf32>
    %8 = arith.maximumf %6, %7 : vector<8x400xf32>
    %9 = arith.truncf %8 : vector<8x400xf32> to vector<8x400xbf16>
    %c0_6 = arith.constant 0 : index
    %c0_7 = arith.constant 0 : index
    %10 = vector.load %arg5[%c0_6, %c0_7] : memref<400x300xbf16, #tpu.memory_space<vmem>>, vector<400x300xbf16>
    %cst_8 = arith.constant dense<0.000000e+00> : vector<8x300xf32>
    %11 = tpu.matmul %9, %10, %cst_8 {dimension_numbers = #tpu.dot_dimension_numbers<[1], [0], [0], [1], [0, 0, 1, 1], [], []>} : vector<8x400xbf16>, vector<400x300xbf16>, vector<8x300xf32> -> vector<8x300xf32>
    %c0_9 = arith.constant 0 : index
    %c0_10 = arith.constant 0 : index
    %12 = vector.load %arg6[%c0_9, %c0_10] : memref<1x300xf32, #tpu.memory_space<vmem>>, vector<1x300xf32>
    %13 = vector.broadcast %12 : vector<1x300xf32> to vector<8x300xf32>
    %14 = arith.addf %11, %13 : vector<8x300xf32>
    %cst_11 = arith.constant 0.000000e+00 : f32
    %15 = vector.broadcast %cst_11 : f32 to vector<8x300xf32>
    %16 = arith.maximumf %14, %15 : vector<8x300xf32>
    %17 = arith.truncf %16 : vector<8x300xf32> to vector<8x300xbf16>
    %c0_12 = arith.constant 0 : index
    %c0_13 = arith.constant 0 : index
    %18 = vector.load %arg7[%c0_12, %c0_13] : memref<300x4xbf16, #tpu.memory_space<vmem>>, vector<300x4xbf16>
    %cst_14 = arith.constant dense<0.000000e+00> : vector<8x4xf32>
    %19 = tpu.matmul %17, %18, %cst_14 {dimension_numbers = #tpu.dot_dimension_numbers<[1], [0], [0], [1], [0, 0, 1, 1], [], []>} : vector<8x300xbf16>, vector<300x4xbf16>, vector<8x4xf32> -> vector<8x4xf32>
    %c0_15 = arith.constant 0 : index
    %c0_16 = arith.constant 0 : index
    %20 = vector.load %arg8[%c0_15, %c0_16] : memref<1x4xf32, #tpu.memory_space<vmem>>, vector<1x4xf32>
    %21 = vector.broadcast %20 : vector<1x4xf32> to vector<8x4xf32>
    %22 = arith.addf %19, %21 : vector<8x4xf32>
    %c0_17 = arith.constant 0 : index
    %23 = memref.load %arg1[%c0_17] : memref<1xf32, #tpu.memory_space<smem>>
    %24 = math.tanh %22 : vector<8x4xf32>
    %25 = vector.broadcast %23 : f32 to vector<8x4xf32>
    %26 = arith.mulf %25, %24 : vector<8x4xf32>
    %c0_18 = arith.constant 0 : index
    %c0_19 = arith.constant 0 : index
    %27 = vector.load %arg9[%c0_18, %c0_19] : memref<8x4xf32, #tpu.memory_space<vmem>>, vector<8x4xf32>
    tpu.vector_store %arg9[%c0_18, %c0_19], %26 {strides = array<i32>} : memref<8x4xf32, #tpu.memory_space<vmem>>, vector<8x4xf32>,
    return
  }
  func.func @transform_0(%arg0: i32) -> i32 {
    %c0_i32 = arith.constant 0 : i32
    %c0_i32_0 = arith.constant 0 : i32
    return %c0_i32 : i32
  }
  func.func @transform_1(%arg0: i32) -> (i32, i32) {
    %c0_i32 = arith.constant 0 : i32
    %c0_i32_0 = arith.constant 0 : i32
    return %arg0, %c0_i32 : i32, i32
  }
  func.func @transform_2(%arg0: i32) -> (i32, i32) {
    %c0_i32 = arith.constant 0 : i32
    %c0_i32_0 = arith.constant 0 : i32
    %c0_i32_1 = arith.constant 0 : i32
    return %c0_i32, %c0_i32_0 : i32, i32
  }
  func.func @transform_3(%arg0: i32) -> (i32, i32) {
    %c0_i32 = arith.constant 0 : i32
    %c0_i32_0 = arith.constant 0 : i32
    %c0_i32_1 = arith.constant 0 : i32
    return %c0_i32, %c0_i32_0 : i32, i32
  }
  func.func @transform_4(%arg0: i32) -> (i32, i32) {
    %c0_i32 = arith.constant 0 : i32
    %c0_i32_0 = arith.constant 0 : i32
    %c0_i32_1 = arith.constant 0 : i32
    return %c0_i32, %c0_i32_0 : i32, i32
  }
  func.func @transform_5(%arg0: i32) -> (i32, i32) {
    %c0_i32 = arith.constant 0 : i32
    %c0_i32_0 = arith.constant 0 : i32
    %c0_i32_1 = arith.constant 0 : i32
    return %c0_i32, %c0_i32_0 : i32, i32
  }
  func.func @transform_6(%arg0: i32) -> (i32, i32) {
    %c0_i32 = arith.constant 0 : i32
    %c0_i32_0 = arith.constant 0 : i32
    %c0_i32_1 = arith.constant 0 : i32
    return %c0_i32, %c0_i32_0 : i32, i32
  }
  func.func @transform_7(%arg0: i32) -> (i32, i32) {
    %c0_i32 = arith.constant 0 : i32
    %c0_i32_0 = arith.constant 0 : i32
    %c0_i32_1 = arith.constant 0 : i32
    return %c0_i32, %c0_i32_0 : i32, i32
  }
  func.func @transform_8(%arg0: i32) -> (i32, i32) {
    %c0_i32 = arith.constant 0 : i32
    %c0_i32_0 = arith.constant 0 : i32
    return %arg0, %c0_i32 : i32, i32
  }
}

</mosaic_0001>

<bundles_post_ra>
// kernel: tpu_custom_call.1
= control target key start
LH: loop header
LB: loop body
LE: loop exit
PB: predicated region body
PF: predicated region fallthrough
CT: control target
= control target key end

     0   :  { %14 = vsyncpa [#allocation4], 0  ;;  %s1698_s0 = inlined_call_operand.<no memory space> [shape: f32[1], index: 0, kind: input, shape index: {}]   ;;  %s1699_s1 = inlined_call_operand.vmem [shape: f32[2,16], index: 1, kind: input, shape index: {}]   ;;  %s1700_s2 = inlined_call_operand.vmem [shape: bf16[16,400], index: 2, kind: input, shape index: {}]   ;;  %s1701_s3 = inlined_call_operand.vmem [shape: f32[1,400], index: 3, kind: input, shape index: {}]   ;;  %s1702_s4 = inlined_call_operand.hbm [shape: bf16[400,300], index: 4, kind: input, shape index: {}]   ;;  %s1703_s5 = inlined_call_operand.vmem [shape: f32[1,300], index: 5, kind: input, shape index: {}]   ;;  %s1704_s6 = inlined_call_operand.vmem [shape: bf16[300,4], index: 6, kind: input, shape index: {}]   ;;  %s1705_s7 = inlined_call_operand.vmem [shape: f32[1,4], index: 7, kind: input, shape index: {}]   ;;  %s1706_s8 = inlined_call_operand.hbm [shape: f32[2,4], index: 8, kind: output, shape index: {}]  }
   0x1   :  { %15 = vsyncpa [#allocation5], 0  ;;  %s1497_s27 = smov [#allocation3]   ;;  %s1449_s9 = scalar_lea.hbm %s1702_s4, 9600 }
   0x2   :  { %s29_s28 = sshll.u32 %s1497_s27, 4  ;;  %p1450_p0 = scmp.ne.s32.totalorder %s1702_s4, %s1449_s9  ;;  %s30_s28 = int_to_ptr.vmem [resolvable:$true] %s29_s28 }
   0x3   :  { %p1453_p1 = scmp.lt.u32.totalorder %s1449_s9, %s1702_s4 }
   0x5   :  { %p1455_p2 = pnand %p1453_p1, %p1450_p0 }
   0x7   :  { %1458 = shalt.err (!%p1455_p2)
}
   0x8   :  { %s1459_s14 = scalar_lea.vmem %s30_s28, 9600  ;;  %p1464_p4 = scmp.lt.s32.totalorder %s30_s28, %s30_s28 }
   0x9   :  { %p1460_p3 = scmp.ne.s32.totalorder %s30_s28, %s1459_s14  ;;  %p1465_p5 = scmp.lt.s32.totalorder %s1459_s14, %s1459_s14 }
   0xb   :  { %p1466_p6 = por %p1465_p5, %p1464_p4 }
   0xd   :  { %p1467_p7 = pnand %p1466_p6, %p1460_p3 }
   0xf   :  { %1470 = shalt.err (!%p1467_p7)
}
  0x10   :  { %s1498_s15 = smov 192   ;;  %s1499_s16 = smov 12  }
  0x11   :  { %35 = dma.hbm_to_vmem [thread:$0]  %s1702_s4, 9600, %s30_s28, [#allocation4], %s1498_s15, %s1498_s15, %s1499_s16  }
  0x12   :  { %1493 = dma.done.wait [#allocation4], 9600  }
  0x13   :  { %1494 = vsyncadd [#allocation4], 4294957696  ;;  %v1500_v0 = vmov 0   ;;  %v1322_v1 = vld [vmem:[%s1700_s2 + $0x4] ss:$16 sps:$4 sm:$0xff]   ;;  %vm94_vm0 = vcmask 130048   ;;  %v54_v56 = vlaneseq }
  0x14   :  { %130 = vmatprep.mubr.bf16.mxu1 %v1500_v0  ;;  %v1324_v2 = vld [vmem:[%s1700_s2] ss:$16 sps:$4 sm:$0xff]   ;;  %98 = vmatprep.subr.bf16.mxu1 %v1322_v1  ;;  %v1325_v5 = vld [vmem:[%s1700_s2 + $0x8] ss:$16 sps:$4 sm:$0xff]   ;;  %v1327_v6 = vld [vmem:[%s1700_s2 + $0xc] ss:$16 sps:$4 sm:$0xff]  }
  0x15   :  { %v46_v3 = vld [vmem:[%s1699_s1] sm:$0xff]  ;;  %99 = vmatpush1.bf16.msra.mxu1 %v1324_v2  ;;  %v1331_v9 = vld [vmem:[#allocation3 + $0x1c] ss:$12 sps:$4 sm:$0xff]   ;;  %v1337_v13 = vld [vmem:[#allocation3 + $0x4c] ss:$12 sps:$4 sm:$0xff]   ;;  %v1583_v57 = vshrl.u32 %v54_v56, 7 }
  0x16   :  { %v47_v4 = vpack.c.bf16 %v46_v3, %v46_v3  ;;  %v1328_v7 = vld [vmem:[#allocation3 + $0x4] ss:$12 sps:$4 sm:$0xff]   ;;  %139 = vmatprep.subr.bf16.mxu1 %v1327_v6  ;;  %v1330_v8 = vld [vmem:[#allocation3] ss:$12 sps:$4 sm:$0xff]   ;;  %v1339_v14 = vld [vmem:[#allocation3 + $0x48] ss:$12 sps:$4 sm:$0xff]  }
  0x17   :  { %708 = vmatprep.subr.bf16.mxu0 %v1328_v7  ;;  %v1333_v10 = vld [vmem:[#allocation3 + $0x18] ss:$12 sps:$4 sm:$0xff]   ;;  %v1334_v11 = vld [vmem:[#allocation3 + $0x34] ss:$12 sps:$4 sm:$0xff]   ;;  %v1336_v12 = vld [vmem:[#allocation3 + $0x30] ss:$12 sps:$4 sm:$0xff]  }
  0x18   :  { %1149 = vmatmul.mubr.msk.bf16.vlgmr.msra.gmra.mrb[0].mxu1 %vm94_vm0, %v47_v4  ;;  %709 = vmatpush1.bf16.msra.mxu0 %v1330_v8  ;;  %v1340_v15 = vld [vmem:[#allocation3 + $0x64] ss:$12 sps:$4 sm:$0xff]   ;;  %v1354_v16 = vld [vmem:[#allocation3 + $0xc8] ss:$12 sps:$4 sm:$0xff]   ;;  %v1342_v18 = vld [vmem:[#allocation3 + $0x60] ss:$12 sps:$4 sm:$0xff]  }
  0x19   :  { %140 = vmatpush1.bf16.msra.mxu1 %v1325_v5  ;;  %171 = vmatprep.mubr.bf16.mxu1 %v1500_v0  ;;  %v1356_v17 = vld [vmem:[#allocation3 + $0x8] ss:$12 sps:$4 sm:$0xff]   ;;  %v1359_v19 = vld [vmem:[#allocation3 + $0xe0] ss:$12 sps:$4 sm:$0xff]   ;;  %v1345_v22 = vld [vmem:[#allocation3 + $0x78] ss:$12 sps:$4 sm:$0xff]  }
  0x1a   :  { %710 = vmatprep.subr.bf16.mxu0 %v1331_v9  ;;  %1249 = vmatprep.subr.bf16.mxu1 %v1354_v16  ;;  %v1343_v20 = vld [vmem:[#allocation3 + $0x7c] ss:$12 sps:$4 sm:$0xff]   ;;  %v1361_v21 = vld [vmem:[#allocation3 + $0x20] ss:$12 sps:$4 sm:$0xff]   ;;  %v1364_v24 = vld [vmem:[#allocation3 + $0xf8] ss:$12 sps:$4 sm:$0xff]  }
  0x1b   :  { %v1346_v23 = vld [vmem:[#allocation3 + $0x94] ss:$12 sps:$4 sm:$0xff]   ;;  %v1366_v25 = vld [vmem:[#allocation3 + $0x38] ss:$12 sps:$4 sm:$0xff]   ;;  %v1348_v26 = vld [vmem:[#allocation3 + $0x90] ss:$12 sps:$4 sm:$0xff]  }
  0x1c   :  { %711 = vmatpush1.bf16.msra.mxu0 %v1333_v10  ;;  %v1369_v27 = vld [vmem:[#allocation3 + $0x110] ss:$12 sps:$4 sm:$0xff]   ;;  %v1349_v29 = vld [vmem:[#allocation3 + $0xac] ss:$12 sps:$4 sm:$0xff]   ;;  %v1374_v30 = vld [vmem:[#allocation3 + $0x128] ss:$12 sps:$4 sm:$0xff]  }
  0x1d   :  { %712 = vmatprep.subr.bf16.mxu0 %v1334_v11  ;;  %v1371_v28 = vld [vmem:[#allocation3 + $0x50] ss:$12 sps:$4 sm:$0xff]   ;;  %v1351_v31 = vld [vmem:[#allocation3 + $0xa8] ss:$12 sps:$4 sm:$0xff]   ;;  %v1355_v34 = vld [vmem:[#allocation3 + $0xc0] ss:$12 sps:$4 sm:$0xff]  }
  0x1e   :  { %v1376_v32 = vld [vmem:[#allocation3 + $0x68] ss:$12 sps:$4 sm:$0xff]   ;;  %v1352_v33 = vld [vmem:[#allocation3 + $0xc4] ss:$12 sps:$4 sm:$0xff]   ;;  %v1379_v35 = vld [vmem:[#allocation3 + $0x140] ss:$12 sps:$4 sm:$0xff]  }
  0x1f   :  { %v1357_v36 = vld [vmem:[#allocation3 + $0xdc] ss:$12 sps:$4 sm:$0xff]   ;;  %v1381_v37 = vld [vmem:[#allocation3 + $0x80] ss:$12 sps:$4 sm:$0xff]   ;;  %v1360_v38 = vld [vmem:[#allocation3 + $0xd8] ss:$12 sps:$4 sm:$0xff]  }
  0x20   :  { %1150 = vmatmul.mubr.msk.bf16.vlgmr.msra.gmra.mrb[4].mxu1 %vm94_vm0, %v47_v4  ;;  %713 = vmatpush1.bf16.msra.mxu0 %v1336_v12  ;;  %v1362_v39 = vld [vmem:[#allocation3 + $0xf4] ss:$12 sps:$4 sm:$0xff]   ;;  %v1365_v40 = vld [vmem:[#allocation3 + $0xf0] ss:$12 sps:$4 sm:$0xff]   ;;  %v1367_v41 = vld [vmem:[#allocation3 + $0x10c] ss:$12 sps:$4 sm:$0xff]  }
  0x21   :  { %714 = vmatprep.subr.bf16.mxu0 %v1337_v13  ;;  %1250 = vmatpush3.bf16.msra.mxu1 %v1356_v17  ;;  %v1370_v42 = vld [vmem:[#allocation3 + $0x108] ss:$12 sps:$4 sm:$0xff]   ;;  %v1372_v43 = vld [vmem:[#allocation3 + $0x124] ss:$12 sps:$4 sm:$0xff]   ;;  %v1375_v44 = vld [vmem:[#allocation3 + $0x120] ss:$12 sps:$4 sm:$0xff]  }
  0x22   :  { %1251 = vmatprep.subr.bf16.mxu1 %v1359_v19  ;;  %v1377_v45 = vld [vmem:[#allocation3 + $0x13c] ss:$12 sps:$4 sm:$0xff]   ;;  %v1380_v46 = vld [vmem:[#allocation3 + $0x138] ss:$12 sps:$4 sm:$0xff]   ;;  %v1382_v47 = vld [vmem:[#allocation3 + $0x154] ss:$12 sps:$4 sm:$0xff]  }
  0x23   :  { %v1384_v48 = vld [vmem:[#allocation3 + $0x158] ss:$12 sps:$4 sm:$0xff]   ;;  %v1385_v49 = vld [vmem:[#allocation3 + $0x150] ss:$12 sps:$4 sm:$0xff]   ;;  %v1390_v53 = vld [vmem:[#allocation3 + $0x168] ss:$12 sps:$4 sm:$0xff]  }
  0x24   :  { %715 = vmatpush1.bf16.msra.mxu0 %v1339_v14  ;;  %v1386_v50 = vld [vmem:[#allocation3 + $0x98] ss:$12 sps:$4 sm:$0xff]   ;;  %v1389_v52 = vld [vmem:[#allocation3 + $0x170] ss:$12 sps:$4 sm:$0xff]   ;;  %v56_v58 = vsub.s32 0, %v1583_v57  ;;  %v60_v60 = vsub.s32 1, %v1583_v57 }
  0x25   :  { %716 = vmatprep.subr.bf16.mxu0 %v1340_v15  ;;  %1252 = vmatpush3.bf16.msra.mxu1 %v1361_v21  ;;  %v1387_v51 = vld [vmem:[#allocation3 + $0x16c] ss:$12 sps:$4 sm:$0xff]   ;;  %v1391_v54 = vld [vmem:[#allocation3 + $0xb0] ss:$12 sps:$4 sm:$0xff]   ;;  %v1589_v59 = vld [vmem:[%s1701_s3] sm:$0xf] }
  0x26   :  { %1253 = vmatprep.subr.bf16.mxu1 %v1364_v24  ;;  %v1394_v55 = vld [vmem:[#allocation3 + $0x184] ss:$12 sps:$4 sm:$0xff]   ;;  %v57_v61 = vrot.slane %v1589_v59, %v56_v58  ;;  %v61_v62 = vrot.slane %v1589_v59, %v60_v60  ;;  %v68_v5 = vsub.s32 3, %v1583_v57  ;;  %v1392_v10 = vld [vmem:[#allocation3 + $0x180] ss:$12 sps:$4 sm:$0xff]   ;;  %vm1038_vm1 = vcmask 1045504  }
  0x27   :  { %v1395_v11 = vld [vmem:[#allocation3 + $0x188] ss:$12 sps:$4 sm:$0xff]   ;;  %v1396_v17 = vld [vmem:[#allocation3 + $0x198] ss:$12 sps:$4 sm:$0xff]   ;;  %v1400_v24 = vld [vmem:[#allocation3 + $0x1b0] ss:$12 sps:$4 sm:$0xff]  }
  0x28   :  { %717 = vmatpush1.bf16.msra.mxu0 %v1342_v18  ;;  %v69_v12 = vrot.slane %v1589_v59, %v68_v5  ;;  %v1398_v14 = vld [vmem:[#allocation3 + $0x19c] ss:$12 sps:$4 sm:$0xff]   ;;  %v1399_v18 = vld [vmem:[#allocation3 + $0x1a0] ss:$12 sps:$4 sm:$0xff]   ;;  %v1433_v56 = vld [vmem:[%s1704_s6 + $0x10] sm:$0xff]   ;;  %vm1502_vm2 = vmmov 0  }
  0x29   :  { %718 = vmatprep.subr.bf16.mxu0 %v1343_v20  ;;  %1254 = vmatpush3.bf16.msra.mxu1 %v1366_v25  ;;  %v1402_v21 = vld [vmem:[#allocation3 + $0x1b4] ss:$12 sps:$4 sm:$0xff]   ;;  %v1403_v25 = vld [vmem:[#allocation3 + $0x1b8] ss:$12 sps:$4 sm:$0xff]   ;;  %vm1034_vm3 = vcmask 359424   ;;  %vm1126_vm4 = vcmask 31744  }
  0x2a   :  { %1255 = vmatprep.subr.bf16.mxu1 %v1369_v27  ;;  %v1406_v27 = vld [vmem:[#allocation3 + $0x1cc] ss:$12 sps:$4 sm:$0xff]   ;;  %v1443_v5 = vld [vmem:[%s1704_s6 + $0x30] sm:$0xff]  }
  0x2c   :  { %719 = vmatpush1.bf16.msra.mxu0 %v1345_v22 }
  0x2d   :  { %720 = vmatprep.subr.bf16.mxu0 %v1346_v23  ;;  %1256 = vmatpush3.bf16.msra.mxu1 %v1371_v28  ;;  %v1404_v28 = vld [vmem:[#allocation3 + $0x1c8] ss:$12 sps:$4 sm:$0xff]  }
  0x2e   :  { %1257 = vmatprep.subr.bf16.mxu1 %v1374_v30  ;;  %v1410_v30 = vld [vmem:[#allocation3 + $0x1e4] ss:$12 sps:$4 sm:$0xff]  }
  0x30   :  { %721 = vmatpush1.bf16.msra.mxu0 %v1348_v26 }
  0x31   :  { %722 = vmatprep.subr.bf16.mxu0 %v1349_v29  ;;  %1258 = vmatpush3.bf16.msra.mxu1 %v1376_v32  ;;  %v1407_v29 = vld [vmem:[#allocation3 + $0x1d0] ss:$12 sps:$4 sm:$0xff]   ;;  %v1411_v32 = vld [vmem:[#allocation3 + $0x1e8] ss:$12 sps:$4 sm:$0xff]  }
  0x32   :  { %1259 = vmatprep.subr.bf16.mxu1 %v1379_v35  ;;  %v1415_v35 = vld [vmem:[#allocation3 + $0x200] ss:$12 sps:$4 sm:$0xff]  }
  0x34   :  { %723 = vmatpush1.bf16.msra.mxu0 %v1351_v31  ;;  %v1408_v31 = vld [vmem:[#allocation3 + $0x1e0] ss:$12 sps:$4 sm:$0xff]  }
  0x35   :  { %724 = vmatprep.subr.bf16.mxu0 %v1352_v33  ;;  %1260 = vmatpush3.bf16.msra.mxu1 %v1381_v37  ;;  %v1414_v33 = vld [vmem:[#allocation3 + $0x1fc] ss:$12 sps:$4 sm:$0xff]   ;;  %v1418_v37 = vld [vmem:[#allocation3 + $0x214] ss:$12 sps:$4 sm:$0xff]  }
  0x36   :  { %1261 = vmatprep.subr.bf16.mxu1 %v1384_v48 }
  0x38   :  { %725 = vmatpush1.bf16.msra.mxu0 %v1355_v34  ;;  %v1412_v34 = vld [vmem:[#allocation3 + $0x1f8] ss:$12 sps:$4 sm:$0xff]  }
  0x39   :  { %726 = vmatprep.subr.bf16.mxu0 %v1357_v36  ;;  %1262 = vmatpush3.bf16.msra.mxu1 %v1386_v50  ;;  %v64_v36 = vsub.s32 2, %v1583_v57  ;;  %v1428_v50 = vld [vmem:[%s1704_s6 + $0x40] sm:$0xff]  }
  0x3a   :  { %1263 = vmatprep.subr.bf16.mxu1 %v1389_v52  ;;  %v1430_v52 = vld [vmem:[%s1704_s6 + $0x48] sm:$0xff]  }
  0x3c   :  { %727 = vmatpush1.bf16.msra.mxu0 %v1360_v38  ;;  %v1416_v38 = vld [vmem:[#allocation3 + $0x210] ss:$12 sps:$4 sm:$0xff]  }
  0x3d   :  { %728 = vmatprep.subr.bf16.mxu0 %v1362_v39  ;;  %1264 = vmatpush3.bf16.msra.mxu1 %v1391_v54  ;;  %v1419_v39 = vld [vmem:[#allocation3 + $0x218] ss:$12 sps:$4 sm:$0xff]  }
  0x3e   :  { %830 = vmatprep.subr.bf16.mxu1 %v1500_v0  ;;  %v1438_v54 = vld [vmem:[%s1704_s6 + $0x80] sm:$0xff]  }
  0x40   :  { %729 = vmatpush1.bf16.msra.mxu0 %v1365_v40  ;;  %v65_v40 = vrot.slane %v1589_v59, %v64_v36  ;;  %v1434_v59 = vld [vmem:[%s1704_s6 + $0x58] sm:$0xff]  }
  0x41   :  { %730 = vmatprep.subr.bf16.mxu0 %v1367_v41  ;;  %v1422_v41 = vld [vmem:[#allocation3 + $0x22c] ss:$12 sps:$4 sm:$0xff]  }
  0x44   :  { %731 = vmatpush1.bf16.msra.mxu0 %v1370_v42  ;;  %v1420_v42 = vld [vmem:[#allocation3 + $0x228] ss:$12 sps:$4 sm:$0xff]  }
  0x45   :  { %732 = vmatprep.subr.bf16.mxu0 %v1372_v43  ;;  %v1423_v43 = vld [vmem:[#allocation3 + $0x230] ss:$12 sps:$4 sm:$0xff]  }
  0x48   :  { %733 = vmatpush1.bf16.msra.mxu0 %v1375_v44 }
  0x49   :  { %734 = vmatprep.subr.bf16.mxu0 %v1377_v45  ;;  %v1426_v45 = vld [vmem:[#allocation3 + $0x244] ss:$12 sps:$4 sm:$0xff]  }
  0x4c   :  { %735 = vmatpush1.bf16.msra.mxu0 %v1380_v46  ;;  %v1424_v46 = vld [vmem:[#allocation3 + $0x240] ss:$12 sps:$4 sm:$0xff]  }
  0x4d   :  { %736 = vmatprep.subr.bf16.mxu0 %v1382_v47  ;;  %v1427_v47 = vld [vmem:[#allocation3 + $0x248] ss:$12 sps:$4 sm:$0xff]  }
  0x50   :  { %737 = vmatpush1.bf16.msra.mxu0 %v1385_v49 }
  0x51   :  { %738 = vmatprep.subr.bf16.mxu0 %v1387_v51  ;;  %v1429_v51 = vld [vmem:[%s1704_s6] sm:$0xff]  }
  0x54   :  { %739 = vmatpush1.bf16.msra.mxu0 %v1390_v53  ;;  %v1501_v53 = vmov 0.0  }
  0x55   :  { %749 = vmatprep.subr.bf16.mxu0 %v1394_v55  ;;  %v1432_v55 = vld [vmem:[%s1704_s6 + $0x50] sm:$0xff]  }
  0xeb   :  { %v132_v63 = vpop.f32.mrb[0].mxu1 }
  0xec   :  { %v133_v1 = vadd.f32 %v132_v63, %v57_v61  ;;  %v134_v2 = vpop.f32.mrb[1].mxu1  ;;  %v1435_v61 = vld [vmem:[%s1704_s6 + $0x18] sm:$0xff]   ;;  %v1437_v63 = vld [vmem:[%s1704_s6 + $0x20] sm:$0xff]  }
  0xed   :  { %v135_v3 = vadd.f32 %v134_v2, %v61_v62  ;;  %v136_v4 = vpop.f32.mrb[2].mxu1  ;;  %v1436_v62 = vld [vmem:[%s1704_s6 + $0x60] sm:$0xff]   ;;  %v1440_v2 = vld [vmem:[%s1704_s6 + $0x28] sm:$0xff]  }
  0xee   :  { %v180_v6 = vmax.f32 %v133_v1, 0.0  ;;  %v137_v7 = vpop.f32.mrb[3].mxu1  ;;  %v1439_v1 = vld [vmem:[%s1704_s6 + $0x68] sm:$0xff]   ;;  %v1442_v4 = vld [vmem:[%s1704_s6 + $0x70] sm:$0xff]  }
  0xef   :  { %v181_v8 = vmax.f32 %v135_v3, 0.0  ;;  %v1441_v3 = vld [vmem:[%s1704_s6 + $0x88] sm:$0xff]  }
  0xf0   :  { %v184_v13 = vpack.c.bf16 %v180_v6, %v180_v6  ;;  %v1444_v6 = vld [vmem:[%s1704_s6 + $0x90] sm:$0x3f]  }
  0xf1   :  { %v185_v9 = vpack.c.bf16 %v181_v8, %v181_v8  ;;  %v1040_v7 = vsel %vm1038_vm1, %v1444_v6, 0  ;;  %v1445_v8 = vld [vmem:[%s1704_s6 + $0x78] sm:$0xff]  }
  0xf3   :  { %740 = vmatprep.mubr.bf16.mxu0 %v185_v9  ;;  %822 = vmatprep.mubr.bf16.mxu1 %v185_v9  ;;  %v173_v15 = vpop.f32.mrb[4].mxu1  ;;  %v1446_v9 = vld [vmem:[%s1704_s6 + $0x38] sm:$0xff]  }
  0xf4   :  { %741 = vmatmul.mubr.bf16.vlgmr.msra.gmra.mrb[0].mxu0 %v184_v13  ;;  %823 = vmatmul.mubr.bf16.vlgmr.msra.gmra.mrb[8].mxu1 %v184_v13  ;;  %v175_v16 = vpop.f32.mrb[5].mxu1  ;;  %v174_v44 = vadd.f32 %v173_v15, %v65_v40  ;;  %v288_v15 = vld [vmem:[%s1703_s5] sm:$0x7] }
  0xf5   :  { %750 = vmatpush1.bf16.msra.mxu0 %v1392_v10  ;;  %831 = vmatpush1.bf16.msra.mxu1 %v1395_v11  ;;  %v176_v19 = vadd.f32 %v175_v16, %v69_v12  ;;  %v177_v20 = vpop.f32.mrb[6].mxu1  ;;  %v301_v16 = vrot.slane %v288_v15, %v64_v36 }
  0xf6   :  { %751 = vmatprep.subr.bf16.mxu0 %v1398_v14  ;;  %832 = vmatprep.subr.bf16.mxu1 %v1500_v0  ;;  %v178_v22 = vpop.f32.mrb[7].mxu1  ;;  %v182_v48 = vmax.f32 %v174_v44, 0.0 }
  0xf7   :  { %v183_v23 = vmax.f32 %v176_v19, 0.0 }
  0xf8   :  { %v186_v49 = vpack.c.bf16 %v182_v48, %v182_v48 }
  0xf9   :  { %752 = vmatpush1.bf16.msra.mxu0 %v1396_v17  ;;  %833 = vmatpush1.bf16.msra.mxu1 %v1399_v18  ;;  %v187_v26 = vpack.c.bf16 %v183_v23, %v183_v23  ;;  %v293_v17 = vrot.slane %v288_v15, %v56_v58  ;;  %v297_v18 = vrot.slane %v288_v15, %v60_v60 }
  0xfa   :  { %753 = vmatprep.subr.bf16.mxu0 %v1402_v21  ;;  %834 = vmatprep.subr.bf16.mxu1 %v1500_v0 }
  0xfb   :  { %1226 = vmatprep.mubr.msk.bf16.mxu0 %vm94_vm0, %v187_v26  ;;  %1227 = vmatprep.mubr.msk.bf16.mxu1 %vm94_vm0, %v187_v26 }
  0xfd   :  { %754 = vmatpush1.bf16.msra.mxu0 %v1400_v24  ;;  %835 = vmatpush1.bf16.msra.mxu1 %v1403_v25 }
  0xfe   :  { %755 = vmatprep.subr.bf16.mxu0 %v1406_v27  ;;  %836 = vmatprep.subr.bf16.mxu1 %v1500_v0 }
 0x101   :  { %756 = vmatpush1.bf16.msra.mxu0 %v1404_v28  ;;  %837 = vmatpush1.bf16.msra.mxu1 %v1407_v29 }
 0x102   :  { %757 = vmatprep.subr.bf16.mxu0 %v1410_v30  ;;  %838 = vmatprep.subr.bf16.mxu1 %v1500_v0 }
 0x105   :  { %758 = vmatpush1.bf16.msra.mxu0 %v1408_v31  ;;  %839 = vmatpush1.bf16.msra.mxu1 %v1411_v32 }
 0x106   :  { %759 = vmatprep.subr.bf16.mxu0 %v1414_v33  ;;  %840 = vmatprep.subr.bf16.mxu1 %v1500_v0 }
 0x109   :  { %760 = vmatpush1.bf16.msra.mxu0 %v1412_v34  ;;  %841 = vmatpush1.bf16.msra.mxu1 %v1415_v35 }
 0x10a   :  { %761 = vmatprep.subr.bf16.mxu0 %v1418_v37  ;;  %842 = vmatprep.subr.bf16.mxu1 %v1500_v0 }
 0x10d   :  { %762 = vmatpush1.bf16.msra.mxu0 %v1416_v38  ;;  %843 = vmatpush1.bf16.msra.mxu1 %v1419_v39  ;;  %v1228_v38 = vld [vmem:[%s1705_s7] ss:$0 sm:$0xff] }
 0x10e   :  { %763 = vmatprep.subr.bf16.mxu0 %v1422_v41  ;;  %844 = vmatprep.subr.bf16.mxu1 %v1500_v0 }
 0x111   :  { %764 = vmatpush1.bf16.msra.mxu0 %v1420_v42  ;;  %845 = vmatpush1.bf16.msra.mxu1 %v1423_v43 }
 0x112   :  { %765 = vmatprep.subr.bf16.mxu0 %v1426_v45  ;;  %846 = vmatprep.subr.bf16.mxu1 %v1500_v0  ;;  %v1431_v0 = vld [vmem:[%s1704_s6 + $0x8] sm:$0xff]  }
 0x115   :  { %766 = vmatpush1.bf16.msra.mxu0 %v1424_v46  ;;  %847 = vmatpush1.bf16.msra.mxu1 %v1427_v47  ;;  %v1124_v46 = vstv %s1698_s0 }
 0x116   :  { %1297 = vmatprep.subr.bf16.mxu0 %v1501_v53  ;;  %1271 = vmatprep.subr.bf16.mxu1 %v1428_v50 }
 0x118   :  { %782 = vmatmul.mubr.bf16.vlgmr.msra.gmra.mrb[0].mxu0 %v186_v49  ;;  %863 = vmatmul.mubr.bf16.vlgmr.msra.gmra.mrb[12].mxu1 %v186_v49 }
 0x119   :  { %1272 = vmatpush3.bf16.msra.mxu1 %v1429_v51  ;;  %1298 = vmatpush3.bf16.msra.mxu0 %v1438_v54 }
 0x11a   :  { %1273 = vmatprep.subr.bf16.mxu1 %v1430_v52  ;;  %1299 = vmatprep.subr.bf16.mxu0 %v1501_v53 }
 0x11b   :  { %1303 = vmatprep.mubr.msk.bf16.mxu0 %vm1502_vm2, %v1501_v53 }
 0x11d   :  { %1274 = vmatpush3.bf16.msra.mxu1 %v1431_v0  ;;  %1300 = vmatpush3.bf16.msra.mxu0 %v1441_v3 }
 0x11e   :  { %1275 = vmatprep.subr.bf16.mxu1 %v1432_v55  ;;  %1301 = vmatprep.subr.bf16.mxu0 %v1501_v53 }
 0x121   :  { %1276 = vmatpush3.bf16.msra.mxu1 %v1433_v56  ;;  %1302 = vmatpush3.bf16.msra.mxu0 %v1040_v7 }
 0x122   :  { %1277 = vmatprep.subr.bf16.mxu1 %v1434_v59 }
 0x125   :  { %1278 = vmatpush3.bf16.msra.mxu1 %v1435_v61 }
 0x126   :  { %1279 = vmatprep.subr.bf16.mxu1 %v1436_v62 }
 0x129   :  { %1280 = vmatpush3.bf16.msra.mxu1 %v1437_v63 }
 0x12a   :  { %1281 = vmatprep.subr.bf16.mxu1 %v1439_v1 }
 0x12d   :  { %1282 = vmatpush3.bf16.msra.mxu1 %v1440_v2 }
 0x12e   :  { %1283 = vmatprep.subr.bf16.mxu1 %v1442_v4 }
 0x131   :  { %1284 = vmatpush3.bf16.msra.mxu1 %v1443_v5 }
 0x132   :  { %1285 = vmatprep.subr.bf16.mxu1 %v1445_v8 }
 0x135   :  { %1286 = vmatpush3.bf16.msra.mxu1 %v1446_v9 }
 0x1c7   :  { %v1265_v10 = vpop.f32.mrb[8].mxu1 }
 0x1c8   :  { %v1266_v11 = vpop.f32.mrb[9].mxu1 }
 0x1c9   :  { %v1267_v12 = vadd.f32 %v1266_v11, %v1265_v10  ;;  %v1268_v13 = vpop.f32.mrb[10].mxu1 }
 0x1ca   :  { %v1269_v14 = vpop.f32.mrb[11].mxu1 }
 0x1cb   :  { %v825_v19 = vadd.f32 %v1267_v12, %v301_v16 }
 0x1eb   :  { %v783_v20 = vpop.f32.mrb[0].mxu0  ;;  %v864_v21 = vpop.f32.mrb[12].mxu1 }
 0x1ec   :  { %v1307_v22 = vadd.f32 %v783_v20, %v293_v17  ;;  %v865_v23 = vadd.f32 %v864_v21, %v825_v19  ;;  %v785_v24 = vpop.f32.mrb[1].mxu0  ;;  %v866_v25 = vpop.f32.mrb[13].mxu1 }
 0x1ed   :  { %v1308_v26 = vadd.f32 %v785_v24, %v297_v18  ;;  %v787_v27 = vpop.f32.mrb[2].mxu0  ;;  %v867_v28 = vpop.f32.mrb[14].mxu1 }
 0x1ee   :  { %v870_v29 = vmax.f32 %v1307_v22, 0.0  ;;  %v872_v30 = vmax.f32 %v865_v23, 0.0  ;;  %v788_v31 = vpop.f32.mrb[3].mxu0  ;;  %v868_v32 = vpop.f32.mrb[15].mxu1 }
 0x1ef   :  { %v871_v33 = vmax.f32 %v1308_v26, 0.0 }
 0x1f0   :  { %v875_v58 = vpack.c.bf16 %v872_v30, %v872_v30  ;;  %v873_v57 = vpack.c.bf16 %v870_v29, %v870_v29 }
 0x1f1   :  { %v874_v34 = vpack.c.bf16 %v871_v33, %v871_v33 }
 0x1f2   :  { %1304 = vmatmul.mubr.msk.bf16.vlgmr.msra.gmra.mrb[4].mxu0 %vm1034_vm3, %v875_v58 }
 0x1f3   :  { %1074 = vmatprep.mubr.bf16.mxu1 %v874_v34 }
 0x1f4   :  { %1075 = vmatmul.mubr.bf16.vlgmr.msra.gmra.mrb[16].mxu1 %v873_v57 }
 0x2c5   :  { %v1116_v60 = vpop.f32.mrb[4].mxu0 }
 0x2c6   :  { %v1305_v35 = vpop.f32.mrb[5].mxu0 }
 0x2c7   :  { %v1287_v36 = vpop.f32.mrb[16].mxu1  ;;  %v1119_v37 = vpop.f32.mrb[6].mxu0 }
 0x2c8   :  { %v1288_v39 = vpop.f32.mrb[17].mxu1  ;;  %v1306_v40 = vpop.f32.mrb[7].mxu0 }
 0x2c9   :  { %v1289_v41 = vadd.f32 %v1288_v39, %v1287_v36  ;;  %v1290_v42 = vpop.f32.mrb[18].mxu1 }
 0x2ca   :  { %v1291_v43 = vpop.f32.mrb[19].mxu1 }
 0x2cb   :  { %v1077_v44 = vadd.f32 %v1289_v41, %v1228_v38 }
 0x2cd   :  { %v1117_v45 = vadd.f32 %v1116_v60, %v1077_v44 }
 0x2cf   :  { %1447 = vtanh.f32 %v1117_v45 }
 0x2d9   :  { %v1448_v47 = vpop.eup %1447 }
 0x2da   :  { %v1125_v48 = vmul.f32 %v1448_v47, %v1124_v46 }
 0x2dc   :  { %1127 = vst.msk [vmem:[#allocation6] sm:$0xff] %vm1126_vm4, %v1125_v48 }
 0x2dd   :  { %1132 = vsyncadd [#allocation5], 96  ;;  %s1503_s21 = smov [#allocation6]  }
 0x2de   :  { %s1133_s22 = sshll.u32 %s1503_s21, 4  ;;  %s1134_s22 = int_to_ptr.vmem [resolvable:$true] %s1133_s22 }
 0x2df   :  { %s1471_s7 = scalar_lea.vmem %s1134_s22, 32  ;;  %s1475_s23 = scalar_lea.vmem %s1134_s22, 128 }
 0x2e0   :  { %p1472_p8 = scmp.ne.s32.totalorder %s1134_s22, %s1471_s7  ;;  %p1476_p9 = scmp.lt.s32.totalorder %s1134_s22, %s1134_s22 }
 0x2e1   :  { %p1477_p10 = scmp.lt.s32.totalorder %s1475_s23, %s1471_s7 }
 0x2e3   :  { %p1478_p11 = por %p1477_p10, %p1476_p9 }
 0x2e5   :  { %p1479_p12 = pnand %p1478_p11, %p1472_p8 }
 0x2e7   :  { %1482 = shalt.err (!%p1479_p12)
}
 0x2e8   :  { %s1483_s0 = scalar_lea.hbm %s1706_s8, 32 }
 0x2e9   :  { %p1484_p13 = scmp.ne.s32.totalorder %s1706_s8, %s1483_s0  ;;  %p1487_p0 = scmp.lt.u32.totalorder %s1483_s0, %s1706_s8 }
 0x2eb   :  { %p1489_p1 = pnand %p1487_p0, %p1484_p13 }
 0x2ed   :  { %1492 = shalt.err (!%p1489_p1)
}
 0x2ee   :  { %s1504_s2 = smov 32   ;;  %s1505_s3 = smov 2  }
 0x2ef   :  { %1139 = dma.vmem_to_hbm [thread:$0]  %s1134_s22, 32, %s1706_s8, [#allocation5], %s1504_s2, %s1504_s2, %s1505_s3  }
 0x2f0   :  { %1495 = dma.done.wait [#allocation5], 128  }
 0x2f1   :  { %1496 = vsyncadd [#allocation5], 4294967168 }
 0x2f2   :  { %1143 = vsyncpa [#allocation4], 1 }
 0x2f3   :  { %1144 = vsyncpa [#allocation5], 1 }

</bundles_post_ra>
